<compile_context>
chip_gen: v7x
topology: tpu7x:2x2x1
jax: 0.10.0
libtpu: 0.0.40
codegen_flags: <defaults>
</compile_context>

<pallas_src>
import math

import jax
import jax.numpy as jnp
from jax.experimental import pallas as pl
from jax.experimental.pallas import tpu as pltpu


# ----------------------------------------------------------------------------
# Fused kernel: rcu_1 -> (+x2) -> rcu_2 -> bilinear up x2 -> 1x1 project
# ----------------------------------------------------------------------------
def _make_fused_kernel(has_skip: bool, H: int, W: int, C: int):
    Wp = W + 2

    def kernel(*refs):
        if has_skip:
            (x1_ref, x2_ref, w_ref, b_ref, ah_ref, m2_ref, bo_ref,
             out_ref, pad_ref) = refs
        else:
            (x1_ref, w_ref, b_ref, ah_ref, m2_ref, bo_ref,
             out_ref, pad_ref) = refs
            x2_ref = None

        cdt = w_ref.dtype   # MXU operand dtype (bf16 in production, f32 for checks)

        # One lane-dense zero store of the small padded scratch per grid step.
        # Interior lanes are fully rewritten before every conv reads them, and
        # doing it every step keeps the kernel correct under "parallel"
        # (per-core) grid sharding where each core's scratch starts undefined.
        pad_ref[...] = jnp.zeros_like(pad_ref)

        def conv3x3(x, j):
            # relu -> single store of the interior lanes (rows stay (H, W*C)
            # lane-packed; the zero halo lanes/rows are untouched).
            pad_ref[1:H + 1, C:(W + 1) * C] = jnp.maximum(x, 0.0)
            # 3 lane-dense MXU matmuls against the block-banded width-stencil
            # matrices (no im2col, no masked column-strip stores).
            acc = jnp.dot(pad_ref[0:H, :].astype(cdt), w_ref[3 * j],
                          preferred_element_type=jnp.float32)
            acc = acc + jnp.dot(pad_ref[1:H + 1, :].astype(cdt), w_ref[3 * j + 1],
                                preferred_element_type=jnp.float32)
            acc = acc + jnp.dot(pad_ref[2:H + 2, :].astype(cdt), w_ref[3 * j + 2],
                                preferred_element_type=jnp.float32)
            return acc + b_ref[j]            # f32 bias row, broadcast over H

        def rcu(x, k):
            h = conv3x3(x, 2 * k)
            h = conv3x3(h, 2 * k + 1)
            return h + x                     # residual add in f32 (VPU)

        x = rcu(x1_ref[0], 0)                # rcu_1      x: (H, W*C) f32
        if x2_ref is not None:
            x = x + x2_ref[0]                # fused skip add (no zeros DMA)
        x = rcu(x, 1)                        # rcu_2

        # Separable bilinear x2 upsample: H-direction as (OH,H)@(H,W*C), then
        # the W-direction interpolation fused with the 1x1 projection into one
        # precomputed (W*C, OW*C) matrix -> lane-dense (OH, OW*C) result.
        u = jnp.dot(ah_ref[...], x.astype(cdt),
                    preferred_element_type=jnp.float32)          # (OH, W*C)
        y = jnp.dot(u.astype(cdt), m2_ref[...],
                    preferred_element_type=jnp.float32)          # (OH, OW*C)
        out_ref[0] = y + bo_ref[...]

    return kernel


# ----------------------------------------------------------------------------
# Hoisted precompute (depends only on weights and spatial size)
# ----------------------------------------------------------------------------
def interp_matrix(out_size, in_size):
    """Row-interp matrix for bilinear, align_corners=True (matches the module's
    F.interpolate(scale_factor=2, mode='bilinear', align_corners=True))."""
    if in_size == 1:
        return jnp.ones((out_size, 1), jnp.float32)
    src = jnp.arange(out_size, dtype=jnp.float32) * (in_size - 1) / (out_size - 1)
    i0 = jnp.clip(jnp.floor(src).astype(jnp.int32), 0, in_size - 2)
    frac = src - i0.astype(jnp.float32)
    rows = jnp.arange(out_size)
    A = jnp.zeros((out_size, in_size), jnp.float32)
    A = A.at[rows, i0].add(1.0 - frac)
    A = A.at[rows, i0 + 1].add(frac)
    return A


def build_constants(params, H, W, mxu_dtype=jnp.bfloat16):
    """Precompute block-banded conv matrices, Ah, and the fused
    (W-interp x 1x1-project) matrix. Call once per (weights, H, W)."""
    C = params["wp"].shape[0]
    Wp, OH, OW = W + 2, 2 * H, 2 * W

    conv_ws = (params["rcu1"][0], params["rcu1"][2],
               params["rcu2"][0], params["rcu2"][2])     # (3,3,Cin,Cout) HWIO
    conv_bs = (params["rcu1"][1], params["rcu1"][3],
               params["rcu2"][1], params["rcu2"][3])

    # Width-shift matrices S_dx of shape (Wp, W): S_dx[w + dx, w] = 1.
    eye = jnp.eye(W, dtype=jnp.float32)
    shifts = [jnp.zeros((Wp, W), jnp.float32).at[dx:dx + W, :].set(eye)
              for dx in range(3)]

    # Block-banded per-dy matrices: B[3k+dy] = sum_dx kron(S_dx, W[dy, dx]).
    # TODO(synk): O(W^2 C^2) memory — fine for small C; switch to per-tap K=C
    #             matmuls (or im2col) at production channel counts.
    bands = []
    for w4 in conv_ws:
        w4 = w4.astype(jnp.float32)
        for dy in range(3):
            B = sum(jnp.kron(shifts[dx], w4[dy, dx]) for dx in range(3))
            bands.append(B)
    w_band = jnp.stack(bands).astype(mxu_dtype)                   # (12, Wp*C, W*C)

    b_rows = jnp.stack([jnp.tile(b.reshape(1, C).astype(jnp.float32), (1, W))
                        for b in conv_bs])                        # (4, 1, W*C) f32

    ah = interp_matrix(OH, H).astype(mxu_dtype)                   # (OH, H)
    aw = interp_matrix(OW, W)                                     # (OW, W)
    # m2[(w*C+cin), (ow*C+cout)] = Aw[ow, w] * wp[cin, cout]
    m2 = jnp.kron(aw.T, params["wp"].astype(jnp.float32)).astype(mxu_dtype)
    b_out = jnp.tile(params["bp"].reshape(1, C).astype(jnp.float32), (1, OW))
    return {"w": w_band, "b": b_rows, "ah": ah, "m2": m2, "b_out": b_out}


# ----------------------------------------------------------------------------
# NHWC-native forward (no HBM transposes at all — reshapes are free)
# ----------------------------------------------------------------------------
def fusion_module_forward_nhwc(params, consts, x1_nhwc, x2_nhwc=None):
    x1 = x1_nhwc.astype(jnp.float32)
    N, H, W, C = x1.shape
    OH, OW, Wp = 2 * H, 2 * W, W + 2
    has_skip = x2_nhwc is not None

    inputs = [x1.reshape(N, H, W * C)]
    in_specs = [pl.BlockSpec((1, H, W * C), lambda n: (n, 0, 0))]
    if has_skip:
        inputs.append(x2_nhwc.astype(jnp.float32).reshape(N, H, W * C))
        in_specs.append(pl.BlockSpec((1, H, W * C), lambda n: (n, 0, 0)))
    inputs += [consts["w"], consts["b"], consts["ah"], consts["m2"],
               consts["b_out"]]
    in_specs += [
        pl.BlockSpec((12, Wp * C, W * C), lambda n: (0, 0, 0)),
        pl.BlockSpec((4, 1, W * C), lambda n: (0, 0, 0)),
        pl.BlockSpec((OH, H), lambda n: (0, 0)),
        pl.BlockSpec((W * C, OW * C), lambda n: (0, 0)),
        pl.BlockSpec((1, OW * C), lambda n: (0, 0)),
    ]

    out = pl.pallas_call(
        _make_fused_kernel(has_skip, H, W, C),
        out_shape=jax.ShapeDtypeStruct((N, OH, OW * C), jnp.float32),
        grid_spec=pltpu.PrefetchScalarGridSpec(
            num_scalar_prefetch=0,
            grid=(N,),
            in_specs=in_specs,
            out_specs=pl.BlockSpec((1, OH, OW * C), lambda n: (n, 0, 0)),
            scratch_shapes=[
                pltpu.VMEM((H + 2, Wp * C), jnp.float32),   # padded image (lane-packed)
            ],
        ),
        compiler_params=pltpu.CompilerParams(
            dimension_semantics=("parallel",)),   # batch -> TCs (2 on v7x)
    )(*inputs)

    return out.reshape(N, OH, OW, C)          # free: same memory order (NHWC)


# ----------------------------------------------------------------------------
# NCHW wrapper (PyTorch-module parity). Production should stay NHWC end-to-end;
# these boundary transposes are the only HBM relayouts left.
# ----------------------------------------------------------------------------
def fusion_module_forward(params, consts, x1_nchw, x2_nchw=None):
    x1 = jnp.transpose(x1_nchw, (0, 2, 3, 1))
    x2 = jnp.transpose(x2_nchw, (0, 2, 3, 1)) if x2_nchw is not None else None
    y = fusion_module_forward_nhwc(params, consts, x1, x2)
    return jnp.transpose(y, (0, 3, 1, 2))     # -> NCHW


# ----------------------------------------------------------------------------
# Pure-JAX reference (independent of the kernel's fused-matrix construction)
# ----------------------------------------------------------------------------
def _conv3x3_ref(x, w, b):
    y = jax.lax.conv_general_dilated(
        x, w, window_strides=(1, 1), padding="SAME",
        dimension_numbers=("NHWC", "HWIO", "NHWC"))
    return y + b.reshape(1, 1, 1, -1)


def _rcu_ref(x, w1, b1, w2, b2):
    h = _conv3x3_ref(jax.nn.relu(x), w1, b1)
    h = _conv3x3_ref(jax.nn.relu(h), w2, b2)
    return h + x


def _fusion_ref(params, x1_nchw, x2_nchw=None):
    x = jnp.transpose(x1_nchw, (0, 2, 3, 1)).astype(jnp.float32)
    w1a, b1a, w2a, b2a = params["rcu1"]
    w1b, b1b, w2b, b2b = params["rcu2"]
    x = _rcu_ref(x, w1a, b1a, w2a, b2a)
    if x2_nchw is not None:
        x = x + jnp.transpose(x2_nchw, (0, 2, 3, 1)).astype(jnp.float32)
    x = _rcu_ref(x, w1b, b1b, w2b, b2b)
    N, H, W, C = x.shape
    Ah = interp_matrix(2 * H, H)
    Aw = interp_matrix(2 * W, W)
    up = jnp.einsum("ph,nhwc->npwc", Ah, x)
    up = jnp.einsum("qw,npwc->npqc", Aw, up)
    y = jnp.einsum("npqc,cd->npqd", up, params["wp"]) \
        + params["bp"].reshape(1, 1, 1, -1)
    return jnp.transpose(y, (0, 3, 1, 2))


# ----------------------------------------------------------------------------
# Main
# ----------------------------------------------------------------------------
if __name__ == "__main__":
    N, C, H, W = 2, 8, 8, 8          # new_embed_size = 8
    key = jax.random.PRNGKey(0)
    ks = jax.random.split(key, 12)

    def conv3_w(k):
        return jax.random.normal(k, (3, 3, C, C), jnp.float32) / math.sqrt(9 * C)

    def conv_b(k):
        return jax.random.normal(k, (1, C), jnp.float32) * 0.01

    params = {
        "rcu1": (conv3_w(ks[0]), conv_b(ks[1]), conv3_w(ks[2]), conv_b(ks[3])),
        "rcu2": (conv3_w(ks[4]), conv_b(ks[5]), conv3_w(ks[6]), conv_b(ks[7])),
        "wp": jax.random.normal(ks[8], (C, C), jnp.float32) / math.sqrt(C),
        "bp": jax.random.normal(ks[9], (1, C), jnp.float32) * 0.01,
    }

    x1 = jax.random.normal(ks[10], (N, C, H, W), jnp.float32)   # NCHW like PyTorch
    x2 = jax.random.normal(ks[11], (N, C, H, W), jnp.float32)

    # ---- tight semantic check with f32 MXU operands ----
    consts_f32 = build_constants(params, H, W, mxu_dtype=jnp.float32)
    out = jax.block_until_ready(fusion_module_forward(params, consts_f32, x1, x2))
    ref = _fusion_ref(params, x1, x2)
    assert out.shape == (N, C, 2 * H, 2 * W), out.shape
    assert jnp.allclose(out, ref, rtol=1e-3, atol=1e-3), \
        float(jnp.max(jnp.abs(out - ref)))

    # x2=None path (no skip operand, no zeros DMA).
    out2 = jax.block_until_ready(fusion_module_forward(params, consts_f32, x1, None))
    ref2 = _fusion_ref(params, x1, None)
    assert jnp.allclose(out2, ref2, rtol=1e-3, atol=1e-3), \
        float(jnp.max(jnp.abs(out2 - ref2)))

    # ---- production path: bf16 MXU operands, f32 accumulation/elementwise ----
    consts_bf16 = build_constants(params, H, W)                 # default bf16
    out_bf = jax.block_until_ready(fusion_module_forward(params, consts_bf16, x1, x2))
    assert jnp.allclose(out_bf, ref, rtol=1e-1, atol=1e-1), \
        float(jnp.max(jnp.abs(out_bf - ref)))                   # bf16 rounding tol

    print("KERNEL_OK")
</pallas_src>

<mosaic_0001>
module attributes {stable_mosaic.version = 11 : i64} {
  func.func @kernel(%arg0: i32, %arg1: memref<1x8x64xf32, #tpu.memory_space<vmem>>, %arg2: memref<1x8x64xf32, #tpu.memory_space<vmem>>, %arg3: memref<12x80x64xf32, #tpu.memory_space<vmem>>, %arg4: memref<4x1x64xf32, #tpu.memory_space<vmem>>, %arg5: memref<16x8xf32, #tpu.memory_space<vmem>>, %arg6: memref<64x128xf32, #tpu.memory_space<vmem>>, %arg7: memref<1x128xf32, #tpu.memory_space<vmem>>, %arg8: memref<1x16x128xf32, #tpu.memory_space<vmem>>, %arg9: memref<10x80xf32, #tpu.memory_space<vmem>>) attributes {dimension_semantics = [#tpu.dimension_semantics<parallel>], iteration_bounds = array<i64: 2>, scalar_prefetch = 0 : i64, scratch_operands = 1 : i64, tpu.core_type = #tpu.core_type<tc>, window_params = [{transform_indices = @transform_0, window_bounds = array<i64: 1, 8, 64>}, {transform_indices = @transform_1, window_bounds = array<i64: 1, 8, 64>}, {pipeline_mode = #tpu.pipeline_mode<synchronous>, transform_indices = @transform_2, window_bounds = array<i64: 12, 80, 64>}, {pipeline_mode = #tpu.pipeline_mode<synchronous>, transform_indices = @transform_3, window_bounds = array<i64: 4, 1, 64>}, {pipeline_mode = #tpu.pipeline_mode<synchronous>, transform_indices = @transform_4, window_bounds = array<i64: 16, 8>}, {pipeline_mode = #tpu.pipeline_mode<synchronous>, transform_indices = @transform_5, window_bounds = array<i64: 64, 128>}, {pipeline_mode = #tpu.pipeline_mode<synchronous>, transform_indices = @transform_6, window_bounds = array<i64: 1, 128>}, {transform_indices = @transform_7, window_bounds = array<i64: 1, 16, 128>}]} {
    %cst = arith.constant 0.000000e+00 : f32
    %0 = vector.broadcast %cst : f32 to vector<10x80xf32>
    %c0 = arith.constant 0 : index
    %c0_0 = arith.constant 0 : index
    %1 = vector.load %arg9[%c0, %c0_0] : memref<10x80xf32, #tpu.memory_space<vmem>>, vector<10x80xf32>
    tpu.vector_store %arg9[%c0, %c0_0], %0 {strides = array<i32>} : memref<10x80xf32, #tpu.memory_space<vmem>>, vector<10x80xf32>,
    %c0_1 = arith.constant 0 : index
    %c0_2 = arith.constant 0 : index
    %c0_3 = arith.constant 0 : index
    %2 = vector.load %arg1[%c0_1, %c0_2, %c0_3] : memref<1x8x64xf32, #tpu.memory_space<vmem>>, vector<1x8x64xf32>
    %3 = vector.shape_cast %2 : vector<1x8x64xf32> to vector<8x64xf32>
    %cst_4 = arith.constant 0.000000e+00 : f32
    %4 = vector.broadcast %cst_4 : f32 to vector<8x64xf32>
    %5 = arith.maximumf %3, %4 : vector<8x64xf32>
    %c1 = arith.constant 1 : index
    %c8 = arith.constant 8 : index
    %6 = vector.load %arg9[%c1, %c8] : memref<10x80xf32, #tpu.memory_space<vmem>>, vector<8x64xf32>
    tpu.vector_store %arg9[%c1, %c8], %5 {strides = array<i32>} : memref<10x80xf32, #tpu.memory_space<vmem>>, vector<8x64xf32>,
    %c0_5 = arith.constant 0 : index
    %c0_6 = arith.constant 0 : index
    %7 = vector.load %arg9[%c0_5, %c0_6] : memref<10x80xf32, #tpu.memory_space<vmem>>, vector<8x80xf32>
    %c0_7 = arith.constant 0 : index
    %c0_8 = arith.constant 0 : index
    %c0_9 = arith.constant 0 : index
    %8 = vector.load %arg3[%c0_7, %c0_8, %c0_9] : memref<12x80x64xf32, #tpu.memory_space<vmem>>, vector<1x80x64xf32>
    %9 = vector.shape_cast %8 : vector<1x80x64xf32> to vector<80x64xf32>
    %cst_10 = arith.constant dense<0.000000e+00> : vector<8x64xf32>
    %10 = tpu.matmul %7, %9, %cst_10 {dimension_numbers = #tpu.dot_dimension_numbers<[1], [0], [0], [1], [0, 0, 1, 1], [], []>} : vector<8x80xf32>, vector<80x64xf32>, vector<8x64xf32> -> vector<8x64xf32>
    %c1_11 = arith.constant 1 : index
    %c0_12 = arith.constant 0 : index
    %11 = vector.load %arg9[%c1_11, %c0_12] : memref<10x80xf32, #tpu.memory_space<vmem>>, vector<8x80xf32>
    %c1_13 = arith.constant 1 : index
    %c0_14 = arith.constant 0 : index
    %c0_15 = arith.constant 0 : index
    %12 = vector.load %arg3[%c1_13, %c0_14, %c0_15] : memref<12x80x64xf32, #tpu.memory_space<vmem>>, vector<1x80x64xf32>
    %13 = vector.shape_cast %12 : vector<1x80x64xf32> to vector<80x64xf32>
    %cst_16 = arith.constant dense<0.000000e+00> : vector<8x64xf32>
    %14 = tpu.matmul %11, %13, %cst_16 {dimension_numbers = #tpu.dot_dimension_numbers<[1], [0], [0], [1], [0, 0, 1, 1], [], []>} : vector<8x80xf32>, vector<80x64xf32>, vector<8x64xf32> -> vector<8x64xf32>
    %15 = arith.addf %10, %14 : vector<8x64xf32>
    %c2 = arith.constant 2 : index
    %c0_17 = arith.constant 0 : index
    %16 = vector.load %arg9[%c2, %c0_17] : memref<10x80xf32, #tpu.memory_space<vmem>>, vector<8x80xf32>
    %c2_18 = arith.constant 2 : index
    %c0_19 = arith.constant 0 : index
    %c0_20 = arith.constant 0 : index
    %17 = vector.load %arg3[%c2_18, %c0_19, %c0_20] : memref<12x80x64xf32, #tpu.memory_space<vmem>>, vector<1x80x64xf32>
    %18 = vector.shape_cast %17 : vector<1x80x64xf32> to vector<80x64xf32>
    %cst_21 = arith.constant dense<0.000000e+00> : vector<8x64xf32>
    %19 = tpu.matmul %16, %18, %cst_21 {dimension_numbers = #tpu.dot_dimension_numbers<[1], [0], [0], [1], [0, 0, 1, 1], [], []>} : vector<8x80xf32>, vector<80x64xf32>, vector<8x64xf32> -> vector<8x64xf32>
    %20 = arith.addf %15, %19 : vector<8x64xf32>
    %c0_22 = arith.constant 0 : index
    %c0_23 = arith.constant 0 : index
    %c0_24 = arith.constant 0 : index
    %21 = vector.load %arg4[%c0_22, %c0_23, %c0_24] : memref<4x1x64xf32, #tpu.memory_space<vmem>>, vector<1x1x64xf32>
    %22 = vector.shape_cast %21 : vector<1x1x64xf32> to vector<1x64xf32>
    %23 = vector.broadcast %22 : vector<1x64xf32> to vector<8x64xf32>
    %24 = arith.addf %20, %23 : vector<8x64xf32>
    %cst_25 = arith.constant 0.000000e+00 : f32
    %25 = vector.broadcast %cst_25 : f32 to vector<8x64xf32>
    %26 = arith.maximumf %24, %25 : vector<8x64xf32>
    %c1_26 = arith.constant 1 : index
    %c8_27 = arith.constant 8 : index
    %27 = vector.load %arg9[%c1_26, %c8_27] : memref<10x80xf32, #tpu.memory_space<vmem>>, vector<8x64xf32>
    tpu.vector_store %arg9[%c1_26, %c8_27], %26 {strides = array<i32>} : memref<10x80xf32, #tpu.memory_space<vmem>>, vector<8x64xf32>,
    %c0_28 = arith.constant 0 : index
    %c0_29 = arith.constant 0 : index
    %28 = vector.load %arg9[%c0_28, %c0_29] : memref<10x80xf32, #tpu.memory_space<vmem>>, vector<8x80xf32>
    %c3 = arith.constant 3 : index
    %c0_30 = arith.constant 0 : index
    %c0_31 = arith.constant 0 : index
    %29 = vector.load %arg3[%c3, %c0_30, %c0_31] : memref<12x80x64xf32, #tpu.memory_space<vmem>>, vector<1x80x64xf32>
    %30 = vector.shape_cast %29 : vector<1x80x64xf32> to vector<80x64xf32>
    %cst_32 = arith.constant dense<0.000000e+00> : vector<8x64xf32>
    %31 = tpu.matmul %28, %30, %cst_32 {dimension_numbers = #tpu.dot_dimension_numbers<[1], [0], [0], [1], [0, 0, 1, 1], [], []>} : vector<8x80xf32>, vector<80x64xf32>, vector<8x64xf32> -> vector<8x64xf32>
    %c1_33 = arith.constant 1 : index
    %c0_34 = arith.constant 0 : index
    %32 = vector.load %arg9[%c1_33, %c0_34] : memref<10x80xf32, #tpu.memory_space<vmem>>, vector<8x80xf32>
    %c4 = arith.constant 4 : index
    %c0_35 = arith.constant 0 : index
    %c0_36 = arith.constant 0 : index
    %33 = vector.load %arg3[%c4, %c0_35, %c0_36] : memref<12x80x64xf32, #tpu.memory_space<vmem>>, vector<1x80x64xf32>
    %34 = vector.shape_cast %33 : vector<1x80x64xf32> to vector<80x64xf32>
    %cst_37 = arith.constant dense<0.000000e+00> : vector<8x64xf32>
    %35 = tpu.matmul %32, %34, %cst_37 {dimension_numbers = #tpu.dot_dimension_numbers<[1], [0], [0], [1], [0, 0, 1, 1], [], []>} : vector<8x80xf32>, vector<80x64xf32>, vector<8x64xf32> -> vector<8x64xf32>
    %36 = arith.addf %31, %35 : vector<8x64xf32>
    %c2_38 = arith.constant 2 : index
    %c0_39 = arith.constant 0 : index
    %37 = vector.load %arg9[%c2_38, %c0_39] : memref<10x80xf32, #tpu.memory_space<vmem>>, vector<8x80xf32>
    %c5 = arith.constant 5 : index
    %c0_40 = arith.constant 0 : index
    %c0_41 = arith.constant 0 : index
    %38 = vector.load %arg3[%c5, %c0_40, %c0_41] : memref<12x80x64xf32, #tpu.memory_space<vmem>>, vector<1x80x64xf32>
    %39 = vector.shape_cast %38 : vector<1x80x64xf32> to vector<80x64xf32>
    %cst_42 = arith.constant dense<0.000000e+00> : vector<8x64xf32>
    %40 = tpu.matmul %37, %39, %cst_42 {dimension_numbers = #tpu.dot_dimension_numbers<[1], [0], [0], [1], [0, 0, 1, 1], [], []>} : vector<8x80xf32>, vector<80x64xf32>, vector<8x64xf32> -> vector<8x64xf32>
    %41 = arith.addf %36, %40 : vector<8x64xf32>
    %c1_43 = arith.constant 1 : index
    %c0_44 = arith.constant 0 : index
    %c0_45 = arith.constant 0 : index
    %42 = vector.load %arg4[%c1_43, %c0_44, %c0_45] : memref<4x1x64xf32, #tpu.memory_space<vmem>>, vector<1x1x64xf32>
    %43 = vector.shape_cast %42 : vector<1x1x64xf32> to vector<1x64xf32>
    %44 = vector.broadcast %43 : vector<1x64xf32> to vector<8x64xf32>
    %45 = arith.addf %41, %44 : vector<8x64xf32>
    %46 = arith.addf %45, %3 : vector<8x64xf32>
    %c0_46 = arith.constant 0 : index
    %c0_47 = arith.constant 0 : index
    %c0_48 = arith.constant 0 : index
    %47 = vector.load %arg2[%c0_46, %c0_47, %c0_48] : memref<1x8x64xf32, #tpu.memory_space<vmem>>, vector<1x8x64xf32>
    %48 = vector.shape_cast %47 : vector<1x8x64xf32> to vector<8x64xf32>
    %49 = arith.addf %46, %48 : vector<8x64xf32>
    %cst_49 = arith.constant 0.000000e+00 : f32
    %50 = vector.broadcast %cst_49 : f32 to vector<8x64xf32>
    %51 = arith.maximumf %49, %50 : vector<8x64xf32>
    %c1_50 = arith.constant 1 : index
    %c8_51 = arith.constant 8 : index
    %52 = vector.load %arg9[%c1_50, %c8_51] : memref<10x80xf32, #tpu.memory_space<vmem>>, vector<8x64xf32>
    tpu.vector_store %arg9[%c1_50, %c8_51], %51 {strides = array<i32>} : memref<10x80xf32, #tpu.memory_space<vmem>>, vector<8x64xf32>,
    %c0_52 = arith.constant 0 : index
    %c0_53 = arith.constant 0 : index
    %53 = vector.load %arg9[%c0_52, %c0_53] : memref<10x80xf32, #tpu.memory_space<vmem>>, vector<8x80xf32>
    %c6 = arith.constant 6 : index
    %c0_54 = arith.constant 0 : index
    %c0_55 = arith.constant 0 : index
    %54 = vector.load %arg3[%c6, %c0_54, %c0_55] : memref<12x80x64xf32, #tpu.memory_space<vmem>>, vector<1x80x64xf32>
    %55 = vector.shape_cast %54 : vector<1x80x64xf32> to vector<80x64xf32>
    %cst_56 = arith.constant dense<0.000000e+00> : vector<8x64xf32>
    %56 = tpu.matmul %53, %55, %cst_56 {dimension_numbers = #tpu.dot_dimension_numbers<[1], [0], [0], [1], [0, 0, 1, 1], [], []>} : vector<8x80xf32>, vector<80x64xf32>, vector<8x64xf32> -> vector<8x64xf32>
    %c1_57 = arith.constant 1 : index
    %c0_58 = arith.constant 0 : index
    %57 = vector.load %arg9[%c1_57, %c0_58] : memref<10x80xf32, #tpu.memory_space<vmem>>, vector<8x80xf32>
    %c7 = arith.constant 7 : index
    %c0_59 = arith.constant 0 : index
    %c0_60 = arith.constant 0 : index
    %58 = vector.load %arg3[%c7, %c0_59, %c0_60] : memref<12x80x64xf32, #tpu.memory_space<vmem>>, vector<1x80x64xf32>
    %59 = vector.shape_cast %58 : vector<1x80x64xf32> to vector<80x64xf32>
    %cst_61 = arith.constant dense<0.000000e+00> : vector<8x64xf32>
    %60 = tpu.matmul %57, %59, %cst_61 {dimension_numbers = #tpu.dot_dimension_numbers<[1], [0], [0], [1], [0, 0, 1, 1], [], []>} : vector<8x80xf32>, vector<80x64xf32>, vector<8x64xf32> -> vector<8x64xf32>
    %61 = arith.addf %56, %60 : vector<8x64xf32>
    %c2_62 = arith.constant 2 : index
    %c0_63 = arith.constant 0 : index
    %62 = vector.load %arg9[%c2_62, %c0_63] : memref<10x80xf32, #tpu.memory_space<vmem>>, vector<8x80xf32>
    %c8_64 = arith.constant 8 : index
    %c0_65 = arith.constant 0 : index
    %c0_66 = arith.constant 0 : index
    %63 = vector.load %arg3[%c8_64, %c0_65, %c0_66] : memref<12x80x64xf32, #tpu.memory_space<vmem>>, vector<1x80x64xf32>
    %64 = vector.shape_cast %63 : vector<1x80x64xf32> to vector<80x64xf32>
    %cst_67 = arith.constant dense<0.000000e+00> : vector<8x64xf32>
    %65 = tpu.matmul %62, %64, %cst_67 {dimension_numbers = #tpu.dot_dimension_numbers<[1], [0], [0], [1], [0, 0, 1, 1], [], []>} : vector<8x80xf32>, vector<80x64xf32>, vector<8x64xf32> -> vector<8x64xf32>
    %66 = arith.addf %61, %65 : vector<8x64xf32>
    %c2_68 = arith.constant 2 : index
    %c0_69 = arith.constant 0 : index
    %c0_70 = arith.constant 0 : index
    %67 = vector.load %arg4[%c2_68, %c0_69, %c0_70] : memref<4x1x64xf32, #tpu.memory_space<vmem>>, vector<1x1x64xf32>
    %68 = vector.shape_cast %67 : vector<1x1x64xf32> to vector<1x64xf32>
    %69 = vector.broadcast %68 : vector<1x64xf32> to vector<8x64xf32>
    %70 = arith.addf %66, %69 : vector<8x64xf32>
    %cst_71 = arith.constant 0.000000e+00 : f32
    %71 = vector.broadcast %cst_71 : f32 to vector<8x64xf32>
    %72 = arith.maximumf %70, %71 : vector<8x64xf32>
    %c1_72 = arith.constant 1 : index
    %c8_73 = arith.constant 8 : index
    %73 = vector.load %arg9[%c1_72, %c8_73] : memref<10x80xf32, #tpu.memory_space<vmem>>, vector<8x64xf32>
    tpu.vector_store %arg9[%c1_72, %c8_73], %72 {strides = array<i32>} : memref<10x80xf32, #tpu.memory_space<vmem>>, vector<8x64xf32>,
    %c0_74 = arith.constant 0 : index
    %c0_75 = arith.constant 0 : index
    %74 = vector.load %arg9[%c0_74, %c0_75] : memref<10x80xf32, #tpu.memory_space<vmem>>, vector<8x80xf32>
    %c9 = arith.constant 9 : index
    %c0_76 = arith.constant 0 : index
    %c0_77 = arith.constant 0 : index
    %75 = vector.load %arg3[%c9, %c0_76, %c0_77] : memref<12x80x64xf32, #tpu.memory_space<vmem>>, vector<1x80x64xf32>
    %76 = vector.shape_cast %75 : vector<1x80x64xf32> to vector<80x64xf32>
    %cst_78 = arith.constant dense<0.000000e+00> : vector<8x64xf32>
    %77 = tpu.matmul %74, %76, %cst_78 {dimension_numbers = #tpu.dot_dimension_numbers<[1], [0], [0], [1], [0, 0, 1, 1], [], []>} : vector<8x80xf32>, vector<80x64xf32>, vector<8x64xf32> -> vector<8x64xf32>
    %c1_79 = arith.constant 1 : index
    %c0_80 = arith.constant 0 : index
    %78 = vector.load %arg9[%c1_79, %c0_80] : memref<10x80xf32, #tpu.memory_space<vmem>>, vector<8x80xf32>
    %c10 = arith.constant 10 : index
    %c0_81 = arith.constant 0 : index
    %c0_82 = arith.constant 0 : index
    %79 = vector.load %arg3[%c10, %c0_81, %c0_82] : memref<12x80x64xf32, #tpu.memory_space<vmem>>, vector<1x80x64xf32>
    %80 = vector.shape_cast %79 : vector<1x80x64xf32> to vector<80x64xf32>
    %cst_83 = arith.constant dense<0.000000e+00> : vector<8x64xf32>
    %81 = tpu.matmul %78, %80, %cst_83 {dimension_numbers = #tpu.dot_dimension_numbers<[1], [0], [0], [1], [0, 0, 1, 1], [], []>} : vector<8x80xf32>, vector<80x64xf32>, vector<8x64xf32> -> vector<8x64xf32>
    %82 = arith.addf %77, %81 : vector<8x64xf32>
    %c2_84 = arith.constant 2 : index
    %c0_85 = arith.constant 0 : index
    %83 = vector.load %arg9[%c2_84, %c0_85] : memref<10x80xf32, #tpu.memory_space<vmem>>, vector<8x80xf32>
    %c11 = arith.constant 11 : index
    %c0_86 = arith.constant 0 : index
    %c0_87 = arith.constant 0 : index
    %84 = vector.load %arg3[%c11, %c0_86, %c0_87] : memref<12x80x64xf32, #tpu.memory_space<vmem>>, vector<1x80x64xf32>
    %85 = vector.shape_cast %84 : vector<1x80x64xf32> to vector<80x64xf32>
    %cst_88 = arith.constant dense<0.000000e+00> : vector<8x64xf32>
    %86 = tpu.matmul %83, %85, %cst_88 {dimension_numbers = #tpu.dot_dimension_numbers<[1], [0], [0], [1], [0, 0, 1, 1], [], []>} : vector<8x80xf32>, vector<80x64xf32>, vector<8x64xf32> -> vector<8x64xf32>
    %87 = arith.addf %82, %86 : vector<8x64xf32>
    %c3_89 = arith.constant 3 : index
    %c0_90 = arith.constant 0 : index
    %c0_91 = arith.constant 0 : index
    %88 = vector.load %arg4[%c3_89, %c0_90, %c0_91] : memref<4x1x64xf32, #tpu.memory_space<vmem>>, vector<1x1x64xf32>
    %89 = vector.shape_cast %88 : vector<1x1x64xf32> to vector<1x64xf32>
    %90 = vector.broadcast %89 : vector<1x64xf32> to vector<8x64xf32>
    %91 = arith.addf %87, %90 : vector<8x64xf32>
    %92 = arith.addf %91, %49 : vector<8x64xf32>
    %c0_92 = arith.constant 0 : index
    %c0_93 = arith.constant 0 : index
    %93 = vector.load %arg5[%c0_92, %c0_93] : memref<16x8xf32, #tpu.memory_space<vmem>>, vector<16x8xf32>
    %cst_94 = arith.constant dense<0.000000e+00> : vector<16x64xf32>
    %94 = tpu.matmul %93, %92, %cst_94 {dimension_numbers = #tpu.dot_dimension_numbers<[1], [0], [0], [1], [0, 0, 1, 1], [], []>} : vector<16x8xf32>, vector<8x64xf32>, vector<16x64xf32> -> vector<16x64xf32>
    %c0_95 = arith.constant 0 : index
    %c0_96 = arith.constant 0 : index
    %95 = vector.load %arg6[%c0_95, %c0_96] : memref<64x128xf32, #tpu.memory_space<vmem>>, vector<64x128xf32>
    %cst_97 = arith.constant dense<0.000000e+00> : vector<16x128xf32>
    %96 = tpu.matmul %94, %95, %cst_97 {dimension_numbers = #tpu.dot_dimension_numbers<[1], [0], [0], [1], [0, 0, 1, 1], [], []>} : vector<16x64xf32>, vector<64x128xf32>, vector<16x128xf32> -> vector<16x128xf32>
    %c0_98 = arith.constant 0 : index
    %c0_99 = arith.constant 0 : index
    %97 = vector.load %arg7[%c0_98, %c0_99] : memref<1x128xf32, #tpu.memory_space<vmem>>, vector<1x128xf32>
    %98 = vector.broadcast %97 : vector<1x128xf32> to vector<16x128xf32>
    %99 = arith.addf %96, %98 : vector<16x128xf32>
    %c0_100 = arith.constant 0 : index
    %c0_101 = arith.constant 0 : index
    %c0_102 = arith.constant 0 : index
    %100 = vector.load %arg8[%c0_100, %c0_101, %c0_102] : memref<1x16x128xf32, #tpu.memory_space<vmem>>, vector<1x16x128xf32>
    %101 = vector.shape_cast %100 : vector<1x16x128xf32> to vector<16x128xf32>
    %102 = vector.shape_cast %99 : vector<16x128xf32> to vector<1x16x128xf32>
    tpu.vector_store %arg8[%c0_100, %c0_101, %c0_102], %102 {strides = array<i32>} : memref<1x16x128xf32, #tpu.memory_space<vmem>>, vector<1x16x128xf32>,
    return
  }
  func.func @transform_0(%arg0: i32) -> (i32, i32, i32) {
    %c0_i32 = arith.constant 0 : i32
    %c0_i32_0 = arith.constant 0 : i32
    %c0_i32_1 = arith.constant 0 : i32
    return %arg0, %c0_i32, %c0_i32_0 : i32, i32, i32
  }
  func.func @transform_1(%arg0: i32) -> (i32, i32, i32) {
    %c0_i32 = arith.constant 0 : i32
    %c0_i32_0 = arith.constant 0 : i32
    %c0_i32_1 = arith.constant 0 : i32
    return %arg0, %c0_i32, %c0_i32_0 : i32, i32, i32
  }
  func.func @transform_2(%arg0: i32) -> (i32, i32, i32) {
    %c0_i32 = arith.constant 0 : i32
    %c0_i32_0 = arith.constant 0 : i32
    %c0_i32_1 = arith.constant 0 : i32
    %c0_i32_2 = arith.constant 0 : i32
    return %c0_i32, %c0_i32_0, %c0_i32_1 : i32, i32, i32
  }
  func.func @transform_3(%arg0: i32) -> (i32, i32, i32) {
    %c0_i32 = arith.constant 0 : i32
    %c0_i32_0 = arith.constant 0 : i32
    %c0_i32_1 = arith.constant 0 : i32
    %c0_i32_2 = arith.constant 0 : i32
    return %c0_i32, %c0_i32_0, %c0_i32_1 : i32, i32, i32
  }
  func.func @transform_4(%arg0: i32) -> (i32, i32) {
    %c0_i32 = arith.constant 0 : i32
    %c0_i32_0 = arith.constant 0 : i32
    %c0_i32_1 = arith.constant 0 : i32
    return %c0_i32, %c0_i32_0 : i32, i32
  }
  func.func @transform_5(%arg0: i32) -> (i32, i32) {
    %c0_i32 = arith.constant 0 : i32
    %c0_i32_0 = arith.constant 0 : i32
    %c0_i32_1 = arith.constant 0 : i32
    return %c0_i32, %c0_i32_0 : i32, i32
  }
  func.func @transform_6(%arg0: i32) -> (i32, i32) {
    %c0_i32 = arith.constant 0 : i32
    %c0_i32_0 = arith.constant 0 : i32
    %c0_i32_1 = arith.constant 0 : i32
    return %c0_i32, %c0_i32_0 : i32, i32
  }
  func.func @transform_7(%arg0: i32) -> (i32, i32, i32) {
    %c0_i32 = arith.constant 0 : i32
    %c0_i32_0 = arith.constant 0 : i32
    %c0_i32_1 = arith.constant 0 : i32
    return %arg0, %c0_i32, %c0_i32_0 : i32, i32, i32
  }
}

</mosaic_0001>

<bundles_post_ra>
// kernel: tpu_custom_call.1
= control target key start
LH: loop header
LB: loop body
LE: loop exit
PB: predicated region body
PF: predicated region fallthrough
CT: control target
= control target key end

     0   :  { %12 = vsyncpa [#allocation4], 0  ;;  %s3232_s0 = inlined_call_operand.vmem [shape: f32[2,8,64], index: 0, kind: input, shape index: {}]   ;;  %s3233_s1 = inlined_call_operand.vmem [shape: f32[2,8,64], index: 1, kind: input, shape index: {}]   ;;  %s3234_s2 = inlined_call_operand.vmem [shape: f32[12,80,64], index: 2, kind: input, shape index: {}]   ;;  %s3235_s3 = inlined_call_operand.vmem [shape: f32[4,1,64], index: 3, kind: input, shape index: {}]   ;;  %s3236_s4 = inlined_call_operand.vmem [shape: f32[16,8], index: 4, kind: input, shape index: {}]   ;;  %s3237_s5 = inlined_call_operand.vmem [shape: f32[64,128], index: 5, kind: input, shape index: {}]   ;;  %s3238_s6 = inlined_call_operand.vmem [shape: f32[1,128], index: 6, kind: input, shape index: {}]   ;;  %s3239_s7 = inlined_call_operand.hbm [shape: f32[2,16,128], index: 7, kind: output, shape index: {}]  }
   0x1   :  { %14 = vsyncpa [#allocation4 + $0x1], 0  ;;  %s2596_s24 = smov 0   ;;  %s2598_s25 = smov 0  }
   0x2   :  { %s2600_s26 = smov 0   ;;  %s2602_s27 = smov 0  }
   0x3 LB: > { %s2617_s28 = sadd.s32 4294967295, %s2548_s27   ;;  %s1654_s29 = sadd.s32 4294967294, %s2548_s27   ;;  %s2548_s27 = sphi %s2602_s27, %s3245_s27   ;;  %s2544_s26 = sphi %s2600_s26, %s3244_s26   ;;  %s2540_s25 = sphi %s2598_s25, %s3243_s25   ;;  %s2536_s24 = sphi %s2596_s24, %s3242_s24  }
   0x4   : > { %s2621_s30 = sadd.s32 1, %s2548_s27   ;;  %s184_s8 = sadd.s32 1, %s2544_s26 }
   0x5   : > { %s181_s9 = ssub.s32 %s2548_s27, %s2621_s30  ;;  %p194_p0 = scmp.ne.s32.totalorder %s2544_s26, %s2540_s25 }
   0x6   : > { %p182_p1 = scmp.eq.s32.totalorder %s181_s9, 0  ;;  %p195_p2 = scmp.eq.s32.totalorder %s2617_s28, 1 }
   0x7   : > { %p200_p3 = scmp.ne.s32.totalorder %s2540_s25, %s2536_s24  ;;  %p201_p4 = scmp.eq.s32.totalorder %s1654_s29, 1 }
   0x8   : > { %s2632_s10 = scalar_select %p182_p1, %s2544_s26, %s184_s8  }
   0x9   : > { %p2634_p5 = por %p195_p2, %p194_p0  ;;  %p2638_p6 = por %p201_p4, %p200_p3 }
   0xa   : > { %p1657_p7 = scmp.ge.s32.totalorder %s2548_s27, 1  ;;  %p248_p8 = scmp.lt.s32.totalorder %s2548_s27, 3 }
   0xc   : > { %p249_p9 = pnand %p1657_p7, %p248_p8 }
   0xd   : > { %p283_p10 = scmp.lt.s32.totalorder (!%p249_p9), %s2617_s28, 1  ;;  %v1661_v0 = vld [vmem:[%s3234_s2 + $0x50] sm:$0xff] (!%p249_p9)  ;;  %v1662_v1 = vld [vmem:[%s3234_s2 + $0x58] sm:$0xff] (!%p249_p9)  ;;  %v304_v2 = vld [vmem:[%s3234_s2] sm:$0xff] (!%p249_p9)  ;;  %v2550_v3 = vmov (!%p249_p9), 0.0|0.0   ;;  %vm291_vm0 = vcmask (!%p249_p9), 654336  }
   0xe   : > { %252 = sbr.rel (%p249_p9) target bundleno = 1922 (0x782), region = 48  ;;  %2246 = vmatprep.subr.bf16.mxu0 (!%p249_p9), %v2550_v3  ;;  %v2247_v4 = vpack.c.bf16 (!%p249_p9), %v1662_v1, %v1661_v0  ;;  %2261 = vmatprep.subr.bf16.mxu1 (!%p249_p9), %v2550_v3  ;;  %v305_v5 = vld [vmem:[%s3234_s2 + $0x8] sm:$0xff] (!%p249_p9)  ;;  %v1663_v6 = vld [vmem:[%s3234_s2 + $0x60] sm:$0xff] (!%p249_p9)  ;;  %vm293_vm1 = vcmask (!%p249_p9), 648192   ;;  %v306_v9 = vld [vmem:[%s3234_s2 + $0x10] sm:$0xff] (!%p249_p9)  ;;  %v2551_v11 = vmov (!%p249_p9), 0.0  }
   0xf   : > { %v1664_v7 = vld [vmem:[%s3234_s2 + $0x68] sm:$0xff] (!%p249_p9)  ;;  %v2262_v8 = vpack.c.bf16 (!%p249_p9), %v305_v5, %v304_v2  ;;  %v307_v10 = vld [vmem:[%s3234_s2 + $0x18] sm:$0xff] (!%p249_p9)  ;;  %292 = vst.msk [vmem:[#allocation2] sm:$0xff] (!%p249_p9), %vm291_vm0, %v2551_v11  ;;  %vm2552_vm2 = vmmov (!%p249_p9), 0   ;;  %v1665_v14 = vld [vmem:[%s3234_s2 + $0x70] sm:$0xff] (!%p249_p9)  ;;  %s2553_s20 = smov (!%p249_p9), 8  }
  0x10   : > { %294 = vst.msk [vmem:[#allocation2 + $0x8] sm:$0x3] (!%p249_p9), %vm293_vm1, %v2551_v11  ;;  %2248 = vmatpush3.bf16.msra.mxu0 (!%p249_p9), %v2247_v4  ;;  %v2250_v12 = vpack.c.bf16 (!%p249_p9), %v1664_v7, %v1663_v6  ;;  %1966 = vmatprep.mubr.msk.f32.mxu0 (!%p249_p9), %vm2552_vm2, %v2551_v11  ;;  %v2265_v13 = vpack.c.bf16 (!%p249_p9), %v307_v10, %v306_v9  ;;  %v1666_v15 = vld [vmem:[%s3234_s2 + $0x78] sm:$0xff] (!%p249_p9)  ;;  %v308_v16 = vld [vmem:[%s3234_s2 + $0x20] sm:$0xff] (!%p249_p9)  ;;  %v309_v17 = vld [vmem:[%s3234_s2 + $0x28] sm:$0xff] (!%p249_p9)  ;;  %vm301_vm3 = vcmask (!%p249_p9), 588864  }
  0x11   : > { %2263 = vmatpush3.bf16.msra.mxu1 (!%p249_p9), %v2262_v8  ;;  %2249 = vmatprep.subr.bf16.mxu0 (!%p249_p9), %v2550_v3  ;;  %v2253_v20 = vpack.c.bf16 (!%p249_p9), %v1666_v15, %v1665_v14  ;;  %v2268_v21 = vpack.c.bf16 (!%p249_p9), %v309_v17, %v308_v16  ;;  %v1667_v22 = vld [vmem:[%s3234_s2 + $0x80] sm:$0xff] (!%p249_p9)  ;;  %v1668_v23 = vld [vmem:[%s3234_s2 + $0x88] sm:$0xff] (!%p249_p9)  ;;  %v310_v24 = vld [vmem:[%s3234_s2 + $0x30] sm:$0xff] (!%p249_p9)  ;;  %vm1385_vm4 = vcmask (!%p249_p9), 64512   ;;  %vm1482_vm5 = vcmask (!%p249_p9), 523264   ;;  %s1800_s21 = sshll.u32 (!%p249_p9), %s2617_s28, 8 }
  0x12   : > { %2264 = vmatprep.subr.bf16.mxu1 (!%p249_p9), %v2550_v3  ;;  %1989 = vmatprep.mubr.msk.f32.mxu1 (!%p249_p9), %vm2552_vm2, %v2551_v11  ;;  %v311_v25 = vld [vmem:[%s3234_s2 + $0x38] sm:$0xff] (!%p249_p9)  ;;  %v2256_v26 = vpack.c.bf16 (!%p249_p9), %v1668_v23, %v1667_v22  ;;  %v1669_v28 = vld [vmem:[%s3234_s2 + $0x90] sm:$0xff] (!%p249_p9)  ;;  %v312_v30 = vld [vmem:[%s3234_s2 + $0x40] sm:$0xff] (!%p249_p9)  ;;  %s3188_s29 = scalar_lea.hbm (!%p249_p9), %s3239_s7, %s1800_s21 }
  0x13   : > { %v2271_v27 = vpack.c.bf16 (!%p249_p9), %v311_v25, %v310_v24  ;;  %v1670_v29 = vld [vmem:[%s3234_s2 + $0x98] sm:$0xff] (!%p249_p9)  ;;  %v313_v31 = vld [vmem:[%s3234_s2 + $0x48] sm:$0xff] (!%p249_p9)  ;;  %v1673_v35 = vld [vmem:[%s3234_s2 + $0xa0] sm:$0xff] (!%p249_p9) }
  0x14   : > { %2251 = vmatpush3.bf16.msra.mxu0 (!%p249_p9), %v2250_v12  ;;  %v2259_v32 = vpack.c.bf16 (!%p249_p9), %v1670_v29, %v1669_v28  ;;  %v2274_v33 = vpack.c.bf16 (!%p249_p9), %v313_v31, %v312_v30  ;;  %v1674_v36 = vld [vmem:[%s3234_s2 + $0xa8] sm:$0xff] (!%p249_p9)  ;;  %v1675_v38 = vld [vmem:[%s3234_s2 + $0xb0] sm:$0xff] (!%p249_p9)  ;;  %v1676_v39 = vld [vmem:[%s3234_s2 + $0xb8] sm:$0xff] (!%p249_p9) }
  0x15   : > { %s2666_s8 = scalar_select %p283_p10, %s2617_s28, 1  ;;  %2266 = vmatpush3.bf16.msra.mxu1 %v2265_v13  ;;  %2252 = vmatprep.subr.bf16.mxu0 %v2550_v3  ;;  %v2277_v37 = vpack.c.bf16 %v1674_v36, %v1673_v35  ;;  %v2280_v42 = vpack.c.bf16 %v1676_v39, %v1675_v38  ;;  %v1677_v43 = vld [vmem:[%s3234_s2 + $0xc0] sm:$0xff]  ;;  %v1678_v44 = vld [vmem:[%s3234_s2 + $0xc8] sm:$0xff]  ;;  %v1679_v46 = vld [vmem:[%s3234_s2 + $0xd0] sm:$0xff] }
  0x16   : > { %2267 = vmatprep.subr.bf16.mxu1 %v2550_v3  ;;  %v2283_v45 = vpack.c.bf16 %v1678_v44, %v1677_v43  ;;  %v1680_v47 = vld [vmem:[%s3234_s2 + $0xd8] sm:$0xff]  ;;  %v1681_v49 = vld [vmem:[%s3234_s2 + $0xe0] sm:$0xff]  ;;  %v1682_v50 = vld [vmem:[%s3234_s2 + $0xe8] sm:$0xff]  ;;  %s2554_s28 = smov [#allocation3]  }
  0x17   : > { %s1659_s16 = sshll.u32 %s2666_s8, 3  ;;  %v2286_v48 = vpack.c.bf16 %v1680_v47, %v1679_v46  ;;  %v2289_v51 = vpack.c.bf16 %v1682_v50, %v1681_v49  ;;  %v1695_v53 = vld [vmem:[%s3234_s2 + $0x140] sm:$0xff]  ;;  %v1696_v54 = vld [vmem:[%s3234_s2 + $0x148] sm:$0xff]  ;;  %v1685_v55 = vld [vmem:[%s3234_s2 + $0xf0] sm:$0xff]  ;;  %s280_s8 = sand.u32 1, %s2540_s25  }
  0x18   : > { %s286_s23 = scalar_lea.vmem %s3232_s0, %s1659_s16  ;;  %2254 = vmatpush3.bf16.msra.mxu0 %v2253_v20  ;;  %v2292_v56 = vpack.c.bf16 %v1696_v54, %v1695_v53  ;;  %v1686_v57 = vld [vmem:[%s3234_s2 + $0xf8] sm:$0xff]  ;;  %v1697_v58 = vld [vmem:[%s3234_s2 + $0x150] sm:$0xff]  ;;  %v1687_v61 = vld [vmem:[%s3234_s2 + $0x100] sm:$0xff]  ;;  %s290_s14 = scalar_lea.vmem %s3233_s1, %s1659_s16 }
  0x19   : > { %v2701_v18 = vld [vmem:[%s286_s23] sm:$0xff]  ;;  %2269 = vmatpush3.bf16.msra.mxu1 %v2268_v21  ;;  %2255 = vmatprep.subr.bf16.mxu0 %v2550_v3  ;;  %v1698_v59 = vld [vmem:[%s3234_s2 + $0x158] sm:$0xff]  ;;  %v2307_v60 = vpack.c.bf16 %v1686_v57, %v1685_v55  ;;  %v1688_v62 = vld [vmem:[%s3234_s2 + $0x108] sm:$0xff]  ;;  %s1658_s16 = sshll.u32 %s280_s8, 4  ;;  %s3190_s9 = scalar_lea.sflag [#allocation4], %s280_s8 }
  0x1a   : > { %v296_v19 = vmax.f32 %v2701_v18, 0.0  ;;  %2270 = vmatprep.subr.bf16.mxu1 %v2550_v3  ;;  %v2295_v63 = vpack.c.bf16 %v1698_v59, %v1697_v58  ;;  %v2310_v0 = vpack.c.bf16 %v1688_v62, %v1687_v61  ;;  %v1699_v1 = vld [vmem:[%s3234_s2 + $0x160] sm:$0xff]  ;;  %v1700_v2 = vld [vmem:[%s3234_s2 + $0x168] sm:$0xff]  ;;  %v1689_v4 = vld [vmem:[%s3234_s2 + $0x110] sm:$0xff]  ;;  %s282_s18 = scalar_lea.vmem [#allocation3], %s1658_s16 }
  0x1b   : > { %v1690_v5 = vld [vmem:[%s3234_s2 + $0x118] sm:$0xff]  ;;  %v2298_v6 = vpack.c.bf16 %v1700_v2, %v1699_v1  ;;  %v1701_v14 = vld [vmem:[%s3234_s2 + $0x170] sm:$0xff]  ;;  %v1691_v17 = vld [vmem:[%s3234_s2 + $0x120] sm:$0xff]  ;;  %s1580_s19 = sshll.u32 %s282_s18, 4  ;;  %s3183_s19 = int_to_ptr.vmem [resolvable:$true] %s1580_s19 }
  0x1c   : > { %298 = vrot.lane.b32.xlu0 %v296_v19, %s2553_s20  ;;  %2257 = vmatpush3.bf16.msra.mxu0 %v2256_v26  ;;  %v2313_v7 = vpack.c.bf16 %v1690_v5, %v1689_v4  ;;  %v1702_v15 = vld [vmem:[%s3234_s2 + $0x178] sm:$0xff]  ;;  %v1692_v19 = vld [vmem:[%s3234_s2 + $0x128] sm:$0xff]  ;;  %v1703_v21 = vld [vmem:[%s3234_s2 + $0x180] sm:$0xff]  ;;  %s2486_s13 = scalar_lea.vmem %s3183_s19, 256 }
  0x1d   : > { %2272 = vmatpush3.bf16.msra.mxu1 %v2271_v27  ;;  %2258 = vmatprep.subr.bf16.mxu0 %v2550_v3  ;;  %v2301_v16 = vpack.c.bf16 %v1702_v15, %v1701_v14  ;;  %v2316_v20 = vpack.c.bf16 %v1692_v19, %v1691_v17  ;;  %v1704_v22 = vld [vmem:[%s3234_s2 + $0x188] sm:$0xff]  ;;  %v1693_v23 = vld [vmem:[%s3234_s2 + $0x130] sm:$0xff]  ;;  %v1694_v25 = vld [vmem:[%s3234_s2 + $0x138] sm:$0xff]  ;;  %p2487_p11 = scmp.ne.s32.totalorder %s3183_s19, %s2486_s13 }
  0x1e   : > { %2273 = vmatprep.subr.bf16.mxu1 %v2550_v3  ;;  %v2304_v24 = vpack.c.bf16 %v1704_v22, %v1703_v21  ;;  %v2319_v26 = vpack.c.bf16 %v1694_v25, %v1693_v23  ;;  %v1684_v28 = vld [vmem:[%s3235_s3] ss:$0 sm:$0xff]  ;;  %v1708_v35 = vld [vmem:[%s3234_s2 + $0x198] sm:$0xff]  ;;  %v1710_v38 = vld [vmem:[%s3234_s2 + $0x1a8] sm:$0xff] }
  0x1f   : > { %v1712_v43 = vld [vmem:[%s3234_s2 + $0x1b8] sm:$0xff]  ;;  %v1714_v46 = vld [vmem:[%s3234_s2 + $0x1c8] sm:$0xff]  ;;  %v1720_v54 = vld [vmem:[%s3234_s2 + $0x1e0] sm:$0xff]  ;;  %p2488_p12 = pnand %p2487_p11, %p2634_p5 }
  0x20   : > { %2260 = vmatpush3.bf16.msra.mxu0 %v2259_v32  ;;  %v1716_v49 = vld [vmem:[%s3234_s2 + $0x1d8] sm:$0xff]  ;;  %v1732_v57 = vld [vmem:[%s3234_s2 + $0x240] sm:$0xff]  ;;  %v1733_v58 = vld [vmem:[%s3234_s2 + $0x248] sm:$0xff] }
  0x21   : > { %2275 = vmatpush3.bf16.msra.mxu1 %v2274_v33  ;;  %2276 = vmatprep.subr.bf16.mxu0 %v2550_v3  ;;  %v1731_v53 = vld [vmem:[%s3234_s2 + $0x238] sm:$0xff]  ;;  %v2340_v62 = vpack.c.bf16 %v1733_v58, %v1732_v57  ;;  %v1724_v2 = vld [vmem:[%s3234_s2 + $0x200] sm:$0xff]  ;;  %v1725_v4 = vld [vmem:[%s3234_s2 + $0x208] sm:$0xff]  ;;  %p2489_p13 = pneg %p2488_p12 }
  0x22   : > { %2291 = vmatprep.subr.bf16.mxu1 %v2550_v3  ;;  %v1723_v61 = vld [vmem:[%s3234_s2 + $0x1f8] sm:$0xff]  ;;  %v1737_v14 = vld [vmem:[%s3234_s2 + $0x268] sm:$0xff]  ;;  %v1728_v22 = vld [vmem:[%s3234_s2 + $0x220] sm:$0xff] }
  0x23   : > { %v1735_v1 = vld [vmem:[%s3234_s2 + $0x258] sm:$0xff]  ;;  %v1767_v58 = vld [vmem:[%s3234_s2 + $0x330] sm:$0xff] }
  0x24   : > { %v1727_v17 = vld [vmem:[%s3234_s2 + $0x218] sm:$0xff] }
  0x25   : > { %v1739_v21 = vld [vmem:[%s3234_s2 + $0x278] sm:$0xff] }
  0x26   : > { %v1756_v57 = vld [vmem:[%s3234_s2 + $0x2d8] sm:$0xff] }
  0x8e   : > { %v299_v34 = vpop.permute.xlu0 %298 }
  0x8f   : > { %302 = vst.msk [vmem:[#allocation2 + $0x1] sm:$0xff] %vm301_vm3, %v299_v34  ;;  %v1707_v34 = vld [vmem:[%s3234_s2 + $0x190] sm:$0xff] }
  0x90   : > { %v2322_v36 = vpack.c.bf16 %v1708_v35, %v1707_v34 }
  0x96   : > { %v314_v40 = vld [vmem:[#allocation2 + $0x1] sm:$0xff] }
  0x97   : > { %v303_v41 = vld [vmem:[#allocation2] sm:$0xff]  ;;  %1967 = vmatmul.mubr.msk.f32.vlgmr.msra.gmra.mrb[0].mxu0 %vm291_vm0, %v314_v40 }
  0x98   : > { %1990 = vmatmul.mubr.msk.f32.vlgmr.msra.gmra.mrb[0].mxu1 %vm291_vm0, %v303_v41  ;;  %2278 = vmatpush3.bf16.msra.mxu0 %v2277_v37  ;;  %v472_v52 = vld [vmem:[#allocation2 + $0x2] sm:$0xff] }
  0x99   : > { %2012 = vmatprep.mubr.msk.f32.mxu0 %vm2552_vm2, %v2551_v11  ;;  %2279 = vmatprep.subr.bf16.mxu0 %v2550_v3  ;;  %v1709_v37 = vld [vmem:[%s3234_s2 + $0x1a0] sm:$0xff] }
  0x9a   : > { %2035 = vmatprep.mubr.msk.f32.mxu1 %vm2552_vm2, %v2551_v11  ;;  %2293 = vmatpush3.bf16.msra.mxu1 %v2292_v56  ;;  %v2325_v41 = vpack.c.bf16 %v1710_v38, %v1709_v37  ;;  %v1721_v56 = vld [vmem:[%s3234_s2 + $0x1e8] sm:$0xff] }
  0x9b   : > { %2294 = vmatprep.subr.bf16.mxu1 %v2550_v3  ;;  %v2352_v59 = vpack.c.bf16 %v1721_v56, %v1720_v54  ;;  %v1743_v37 = vld [vmem:[%s3234_s2 + $0x288] sm:$0xff] }
  0x9c   : > { %2281 = vmatpush3.bf16.msra.mxu0 %v2280_v42  ;;  %v1711_v42 = vld [vmem:[%s3234_s2 + $0x1b0] sm:$0xff]  ;;  %v1766_v54 = vld [vmem:[%s3234_s2 + $0x328] sm:$0xff] }
  0x9d   : > { %2282 = vmatprep.subr.bf16.mxu0 %v2550_v3  ;;  %v2328_v44 = vpack.c.bf16 %v1712_v43, %v1711_v42  ;;  %v1746_v43 = vld [vmem:[%s3234_s2 + $0x2a0] sm:$0xff] }
  0x9e   : > { %2296 = vmatpush3.bf16.msra.mxu1 %v2295_v63 }
  0x9f   : > { %2297 = vmatprep.subr.bf16.mxu1 %v2550_v3 }
  0xa0   : > { %2284 = vmatpush3.bf16.msra.mxu0 %v2283_v45  ;;  %v1713_v45 = vld [vmem:[%s3234_s2 + $0x1c0] sm:$0xff] }
  0xa1   : > { %2285 = vmatprep.subr.bf16.mxu0 %v2550_v3  ;;  %v2331_v47 = vpack.c.bf16 %v1714_v46, %v1713_v45  ;;  %v1748_v46 = vld [vmem:[%s3234_s2 + $0x2b0] sm:$0xff] }
  0xa2   : > { %2299 = vmatpush3.bf16.msra.mxu1 %v2298_v6  ;;  %v2358_v6 = vpack.c.bf16 %v1725_v4, %v1724_v2  ;;  %v1770_v2 = vld [vmem:[%s3234_s2 + $0x348] sm:$0xff]  ;;  %v1759_v4 = vld [vmem:[%s3234_s2 + $0x2f0] sm:$0xff] }
  0xa3   : > { %2300 = vmatprep.subr.bf16.mxu1 %v2550_v3 }
  0xa4   : > { %2287 = vmatpush3.bf16.msra.mxu0 %v2286_v48  ;;  %v1715_v48 = vld [vmem:[%s3234_s2 + $0x1d0] sm:$0xff] }
  0xa5   : > { %2288 = vmatprep.subr.bf16.mxu0 %v2550_v3  ;;  %v2334_v50 = vpack.c.bf16 %v1716_v49, %v1715_v48  ;;  %v1750_v49 = vld [vmem:[%s3234_s2 + $0x2c0] sm:$0xff] }
  0xa6   : > { %2302 = vmatpush3.bf16.msra.mxu1 %v2301_v16  ;;  %v1726_v16 = vld [vmem:[%s3234_s2 + $0x210] sm:$0xff] }
  0xa7   : > { %2303 = vmatprep.subr.bf16.mxu1 %v2550_v3  ;;  %v2361_v19 = vpack.c.bf16 %v1727_v17, %v1726_v16  ;;  %v1761_v17 = vld [vmem:[%s3234_s2 + $0x300] sm:$0xff] }
  0xa8   : > { %2290 = vmatpush3.bf16.msra.mxu0 %v2289_v51 }
  0xa9   : > { %2306 = vmatprep.subr.bf16.mxu0 %v2550_v3 }
  0xaa   : > { %2305 = vmatpush3.bf16.msra.mxu1 %v2304_v24  ;;  %v1729_v24 = vld [vmem:[%s3234_s2 + $0x228] sm:$0xff] }
  0xab   : > { %2013 = vmatmul.mubr.msk.f32.vlgmr.msra.gmra.mrb[2].mxu0 %vm291_vm0, %v472_v52  ;;  %2321 = vmatprep.subr.bf16.mxu1 %v2550_v3  ;;  %v1730_v52 = vld [vmem:[%s3234_s2 + $0x230] sm:$0xff] }
  0xac   : > { %2058 = vmatprep.mubr.msk.f32.mxu0 %vm2552_vm2, %v2551_v11  ;;  %2308 = vmatpush3.bf16.msra.mxu0 %v2307_v60  ;;  %v2337_v55 = vpack.c.bf16 %v1731_v53, %v1730_v52  ;;  %v1722_v60 = vld [vmem:[%s3234_s2 + $0x1f0] sm:$0xff]  ;;  %v1765_v53 = vld [vmem:[%s3234_s2 + $0x320] sm:$0xff] }
  0xad   : > { %2309 = vmatprep.subr.bf16.mxu0 %v2550_v3  ;;  %v2355_v63 = vpack.c.bf16 %v1723_v61, %v1722_v60  ;;  %v2382_v56 = vpack.c.bf16 %v1766_v54, %v1765_v53  ;;  %v1757_v61 = vld [vmem:[%s3234_s2 + $0x2e0] sm:$0xff]  ;;  %v1468_v53 = vld [vmem:[%s3237_s5 + $0x8] sm:$0xff] }
  0xb0   : > { %2311 = vmatpush3.bf16.msra.mxu0 %v2310_v0  ;;  %v1734_v0 = vld [vmem:[%s3234_s2 + $0x250] sm:$0xff] }
  0xb1   : > { %2312 = vmatprep.subr.bf16.mxu0 %v2550_v3  ;;  %v2343_v5 = vpack.c.bf16 %v1735_v1, %v1734_v0  ;;  %v1769_v1 = vld [vmem:[%s3234_s2 + $0x340] sm:$0xff] }
  0xb4   : > { %2314 = vmatpush3.bf16.msra.mxu0 %v2313_v7 }
  0xb5   : > { %2315 = vmatprep.subr.bf16.mxu0 %v2550_v3 }
  0xb8   : > { %2317 = vmatpush3.bf16.msra.mxu0 %v2316_v20  ;;  %v1738_v20 = vld [vmem:[%s3234_s2 + $0x270] sm:$0xff] }
  0xb9   : > { %2318 = vmatprep.subr.bf16.mxu0 %v2550_v3  ;;  %v2349_v23 = vpack.c.bf16 %v1739_v21, %v1738_v20  ;;  %v1773_v21 = vld [vmem:[%s3234_s2 + $0x360] sm:$0xff] }
  0xbc   : > { %2320 = vmatpush3.bf16.msra.mxu0 %v2319_v26  ;;  %v1719_v26 = vld [vmem:[%s3235_s3 + $0x1] ss:$0 sm:$0xff] }
  0xbd   : > { %2336 = vmatprep.subr.bf16.mxu0 %v2550_v3 }
 0x16a   : > { %v395_v8 = vpop.f32.mrb[0].mxu0 }
 0x16b   : > { %v468_v9 = vpop.f32.mrb[0].mxu1  ;;  %v1968_v12 = vpop.f32.mrb[1].mxu0 }
 0x16c   : > { %v469_v10 = vadd.f32 %v468_v9, %v395_v8  ;;  %v1991_v13 = vpop.f32.mrb[1].mxu1 }
 0x16d   : > { %v1736_v13 = vld [vmem:[%s3234_s2 + $0x260] sm:$0xff] }
 0x16e   : > { %v2346_v15 = vpack.c.bf16 %v1737_v14, %v1736_v13  ;;  %v1771_v14 = vld [vmem:[%s3234_s2 + $0x350] sm:$0xff] }
 0x17e   : > { %v553_v27 = vpop.f32.mrb[2].mxu0 }
 0x17f   : > { %v557_v29 = vadd.f32 %v553_v27, %v469_v10  ;;  %v2014_v30 = vpop.f32.mrb[3].mxu0  ;;  %v2364_v27 = vpack.c.bf16 %v1729_v24, %v1728_v22  ;;  %v1774_v22 = vld [vmem:[%s3234_s2 + $0x368] sm:$0xff] }
 0x180   : > { %v2394_v24 = vpack.c.bf16 %v1774_v22, %v1773_v21 }
 0x181   : > { %v565_v31 = vadd.f32 %v1684_v28, %v557_v29 }
 0x183   : > { %v566_v32 = vmax.f32 %v565_v31, 0.0  ;;  %v838_v31 = vld [vmem:[%s290_s14] sm:$0xff]  ;;  %s2490_s14 = sshll.u32 %s2554_s28, 4  ;;  %s2491_s14 = int_to_ptr.vmem [resolvable:$false] %s2490_s14 }
 0x184   : > { %s2492_s16 = scalar_lea.vmem %s2491_s14, 512  ;;  %p2493_p0 = scmp.lt.s32.totalorder %s3183_s19, %s2491_s14 }
 0x185   : > { %568 = vrot.lane.b32.xlu0 %v566_v32, %s2553_s20  ;;  %p2494_p1 = scmp.lt.s32.totalorder %s2492_s16, %s2486_s13 }
 0x187   : > { %p2495_p2 = por %p2494_p1, %p2493_p0 }
 0x189   : > { %p2496_p3 = pnand %p2495_p2, %p2489_p13 }
 0x1f7   : > { %v569_v33 = vpop.permute.xlu0 %568 }
 0x1f8   : > { %571 = vst.msk [vmem:[#allocation2 + $0x1] sm:$0xff] %vm301_vm3, %v569_v33 }
 0x1ff   : > { %v584_v39 = vld [vmem:[#allocation2 + $0x1] sm:$0xff] }
 0x200   : > { %v572_v40 = vld [vmem:[#allocation2] sm:$0xff]  ;;  %2036 = vmatmul.mubr.msk.f32.vlgmr.msra.gmra.mrb[2].mxu1 %vm291_vm0, %v584_v39  ;;  %v1745_v39 = vld [vmem:[%s3234_s2 + $0x298] sm:$0xff] }
 0x201   : > { %2059 = vmatmul.mubr.msk.f32.vlgmr.msra.gmra.mrb[4].mxu0 %vm291_vm0, %v572_v40  ;;  %2323 = vmatpush3.bf16.msra.mxu1 %v2322_v36  ;;  %v742_v51 = vld [vmem:[#allocation2 + $0x2] sm:$0xff] }
 0x202   : > { %2081 = vmatprep.mubr.msk.f32.mxu1 %vm2552_vm2, %v2551_v11  ;;  %2324 = vmatprep.subr.bf16.mxu1 %v2550_v3  ;;  %v1742_v36 = vld [vmem:[%s3234_s2 + $0x280] sm:$0xff] }
 0x203   : > { %2104 = vmatprep.mubr.msk.f32.mxu0 %vm2552_vm2, %v2551_v11  ;;  %2338 = vmatpush3.bf16.msra.mxu0 %v2337_v55  ;;  %v2367_v38 = vpack.c.bf16 %v1743_v37, %v1742_v36  ;;  %v1755_v55 = vld [vmem:[%s3234_s2 + $0x2d0] sm:$0xff]  ;;  %v1778_v36 = vld [vmem:[%s3234_s2 + $0x378] sm:$0xff] }
 0x204   : > { %2339 = vmatprep.subr.bf16.mxu0 %v2550_v3  ;;  %v2397_v60 = vpack.c.bf16 %v1756_v57, %v1755_v55  ;;  %v1470_v55 = vld [vmem:[%s3237_s5 + $0x18] sm:$0xff]  ;;  %v1471_v57 = vld [vmem:[%s3237_s5 + $0x20] sm:$0xff] }
 0x205   : > { %2326 = vmatpush3.bf16.msra.mxu1 %v2325_v41 }
 0x206   : > { %2327 = vmatprep.subr.bf16.mxu1 %v2550_v3 }
 0x207   : > { %2341 = vmatpush3.bf16.msra.mxu0 %v2340_v62  ;;  %v1758_v62 = vld [vmem:[%s3234_s2 + $0x2e8] sm:$0xff] }
 0x208   : > { %2342 = vmatprep.subr.bf16.mxu0 %v2550_v3  ;;  %v2400_v0 = vpack.c.bf16 %v1758_v62, %v1757_v61  ;;  %v1474_v61 = vld [vmem:[%s3237_s5 + $0x38] sm:$0xff] }
 0x209   : > { %2329 = vmatpush3.bf16.msra.mxu1 %v2328_v44  ;;  %v1747_v44 = vld [vmem:[%s3234_s2 + $0x2a8] sm:$0xff] }
 0x20a   : > { %2330 = vmatprep.subr.bf16.mxu1 %v2550_v3  ;;  %v2373_v45 = vpack.c.bf16 %v1747_v44, %v1746_v43  ;;  %v1782_v43 = vld [vmem:[%s3234_s2 + $0x398] sm:$0xff] }
 0x20b   : > { %2344 = vmatpush3.bf16.msra.mxu0 %v2343_v5  ;;  %v1760_v5 = vld [vmem:[%s3234_s2 + $0x2f8] sm:$0xff] }
 0x20c   : > { %2345 = vmatprep.subr.bf16.mxu0 %v2550_v3 }
 0x20d   : > { %2332 = vmatpush3.bf16.msra.mxu1 %v2331_v47  ;;  %v1749_v47 = vld [vmem:[%s3234_s2 + $0x2b8] sm:$0xff] }
 0x20e   : > { %2333 = vmatprep.subr.bf16.mxu1 %v2550_v3  ;;  %v2376_v48 = vpack.c.bf16 %v1749_v47, %v1748_v46  ;;  %v1785_v47 = vld [vmem:[%s3234_s2 + $0x3b0] sm:$0xff] }
 0x20f   : > { %2347 = vmatpush3.bf16.msra.mxu0 %v2346_v15  ;;  %v1772_v15 = vld [vmem:[%s3234_s2 + $0x358] sm:$0xff] }
 0x210   : > { %2348 = vmatprep.subr.bf16.mxu0 %v2550_v3  ;;  %v2391_v16 = vpack.c.bf16 %v1772_v15, %v1771_v14 }
 0x211   : > { %2335 = vmatpush3.bf16.msra.mxu1 %v2334_v50  ;;  %v1751_v50 = vld [vmem:[%s3234_s2 + $0x2c8] sm:$0xff] }
 0x212   : > { %2351 = vmatprep.subr.bf16.mxu1 %v2550_v3 }
 0x213   : > { %2350 = vmatpush3.bf16.msra.mxu0 %v2349_v23  ;;  %v1763_v23 = vld [vmem:[%s3234_s2 + $0x310] sm:$0xff] }
 0x214   : > { %2082 = vmatmul.mubr.msk.f32.vlgmr.msra.gmra.mrb[4].mxu1 %vm291_vm0, %v742_v51  ;;  %2366 = vmatprep.subr.bf16.mxu0 %v2550_v3  ;;  %v2379_v51 = vpack.c.bf16 %v1751_v50, %v1750_v49 }
 0x215   : > { %2127 = vmatprep.mubr.msk.f32.mxu1 %vm2552_vm2, %v2551_v11  ;;  %2353 = vmatpush3.bf16.msra.mxu1 %v2352_v59  ;;  %v1768_v59 = vld [vmem:[%s3234_s2 + $0x338] sm:$0xff] }
 0x216   : > { %2354 = vmatprep.subr.bf16.mxu1 %v2550_v3 }
 0x219   : > { %2356 = vmatpush3.bf16.msra.mxu1 %v2355_v63  ;;  %v2385_v63 = vpack.c.bf16 %v1768_v59, %v1767_v58  ;;  %v1472_v58 = vld [vmem:[%s3237_s5 + $0x28] sm:$0xff] }
 0x21a   : > { %2357 = vmatprep.subr.bf16.mxu1 %v2550_v3  ;;  %v2434_v59 = vpack.c.bf16 %v1472_v58, %v1471_v57 }
 0x21d   : > { %2359 = vmatpush3.bf16.msra.mxu1 %v2358_v6  ;;  %v2388_v6 = vpack.c.bf16 %v1770_v2, %v1769_v1 }
 0x21e   : > { %2360 = vmatprep.subr.bf16.mxu1 %v2550_v3 }
 0x221   : > { %2362 = vmatpush3.bf16.msra.mxu1 %v2361_v19  ;;  %v1762_v19 = vld [vmem:[%s3234_s2 + $0x308] sm:$0xff] }
 0x222   : > { %2363 = vmatprep.subr.bf16.mxu1 %v2550_v3  ;;  %v2406_v20 = vpack.c.bf16 %v1762_v19, %v1761_v17 }
 0x225   : > { %2365 = vmatpush3.bf16.msra.mxu1 %v2364_v27 }
 0x226   : > { %2381 = vmatprep.subr.bf16.mxu1 %v2550_v3 }
 0x2d3   : > { %v665_v7 = vpop.f32.mrb[2].mxu1 }
 0x2d4   : > { %v738_v8 = vpop.f32.mrb[4].mxu0  ;;  %v2037_v10 = vpop.f32.mrb[3].mxu1 }
 0x2d5   : > { %v739_v9 = vadd.f32 %v738_v8, %v665_v7  ;;  %v2060_v12 = vpop.f32.mrb[5].mxu0  ;;  %v2403_v7 = vpack.c.bf16 %v1760_v5, %v1759_v4 }
 0x2e7   : > { %v823_v25 = vpop.f32.mrb[4].mxu1 }
 0x2e8   : > { %v827_v28 = vadd.f32 %v823_v25, %v739_v9  ;;  %v2083_v29 = vpop.f32.mrb[5].mxu1  ;;  %v1764_v25 = vld [vmem:[%s3234_s2 + $0x318] sm:$0xff] }
 0x2ea   : > { %v836_v30 = vadd.f32 %v1719_v26, %v827_v28  ;;  %v2409_v26 = vpack.c.bf16 %v1764_v25, %v1763_v23  ;;  %v1754_v28 = vld [vmem:[%s3235_s3 + $0x2] ss:$0 sm:$0xff] }
 0x2ec   : > { %v837_v32 = vadd.f32 %v836_v30, %v2701_v18  ;;  %v1744_v18 = vld [vmem:[%s3234_s2 + $0x290] sm:$0xff] }
 0x2ed   : > { %v2370_v42 = vpack.c.bf16 %v1745_v39, %v1744_v18  ;;  %v1780_v18 = vld [vmem:[%s3234_s2 + $0x388] sm:$0xff] }
 0x2ee   : > { %v2980_v33 = vadd.f32 %v838_v31, %v837_v32 }
 0x2f0   : > { %v840_v34 = vmax.f32 %v2980_v33, 0.0 }
 0x2f2   : > { %842 = vrot.lane.b32.xlu1 %v840_v34, %s2553_s20 }
 0x364   : > { %v843_v35 = vpop.permute.xlu1 %842 }
 0x365   : > { %845 = vst.msk [vmem:[#allocation2 + $0x1] sm:$0xff] %vm301_vm3, %v843_v35  ;;  %v1777_v35 = vld [vmem:[%s3234_s2 + $0x370] sm:$0xff] }
 0x366   : > { %v2412_v37 = vpack.c.bf16 %v1778_v36, %v1777_v35 }
 0x36c   : > { %v858_v40 = vld [vmem:[#allocation2 + $0x1] sm:$0xff] }
 0x36d   : > { %v846_v41 = vld [vmem:[#allocation2] sm:$0xff]  ;;  %2105 = vmatmul.mubr.msk.f32.vlgmr.msra.gmra.mrb[6].mxu0 %vm291_vm0, %v858_v40 }
 0x36e   : > { %2128 = vmatmul.mubr.msk.f32.vlgmr.msra.gmra.mrb[6].mxu1 %vm291_vm0, %v846_v41  ;;  %2368 = vmatpush3.bf16.msra.mxu0 %v2367_v38  ;;  %v1016_v52 = vld [vmem:[#allocation2 + $0x2] sm:$0xff] }
 0x36f   : > { %2150 = vmatprep.mubr.msk.f32.mxu0 %vm2552_vm2, %v2551_v11  ;;  %2369 = vmatprep.subr.bf16.mxu0 %v2550_v3  ;;  %v1779_v38 = vld [vmem:[%s3234_s2 + $0x380] sm:$0xff] }
 0x370   : > { %2173 = vmatprep.mubr.msk.f32.mxu1 %vm2552_vm2, %v2551_v11  ;;  %2383 = vmatpush3.bf16.msra.mxu1 %v2382_v56  ;;  %v2415_v41 = vpack.c.bf16 %v1780_v18, %v1779_v38 }
 0x371   : > { %2384 = vmatprep.subr.bf16.mxu1 %v2550_v3 }
 0x372   : > { %2371 = vmatpush3.bf16.msra.mxu0 %v2370_v42  ;;  %v1781_v42 = vld [vmem:[%s3234_s2 + $0x390] sm:$0xff] }
 0x373   : > { %2372 = vmatprep.subr.bf16.mxu0 %v2550_v3  ;;  %v2418_v44 = vpack.c.bf16 %v1782_v43, %v1781_v42 }
 0x374   : > { %2386 = vmatpush3.bf16.msra.mxu1 %v2385_v63 }
 0x375   : > { %2387 = vmatprep.subr.bf16.mxu1 %v2550_v3 }
 0x376   : > { %2374 = vmatpush3.bf16.msra.mxu0 %v2373_v45  ;;  %v1783_v45 = vld [vmem:[%s3234_s2 + $0x3a0] sm:$0xff] }
 0x377   : > { %2375 = vmatprep.subr.bf16.mxu0 %v2550_v3 }
 0x378   : > { %2389 = vmatpush3.bf16.msra.mxu1 %v2388_v6  ;;  %v1789_v6 = vld [vmem:[%s3235_s3 + $0x3] ss:$0 sm:$0xff] }
 0x379   : > { %2390 = vmatprep.subr.bf16.mxu1 %v2550_v3 }
 0x37a   : > { %2377 = vmatpush3.bf16.msra.mxu0 %v2376_v48  ;;  %v1786_v48 = vld [vmem:[%s3234_s2 + $0x3b8] sm:$0xff] }
 0x37b   : > { %2378 = vmatprep.subr.bf16.mxu0 %v2550_v3  ;;  %v2424_v49 = vpack.c.bf16 %v1786_v48, %v1785_v47 }
 0x37c   : > { %2392 = vmatpush3.bf16.msra.mxu1 %v2391_v16 }
 0x37d   : > { %2393 = vmatprep.subr.bf16.mxu1 %v2550_v3 }
 0x37e   : > { %2380 = vmatpush3.bf16.msra.mxu0 %v2379_v51  ;;  %v1383_v51 = vld [vmem:[%s3236_s4] sm:$0xff] }
 0x37f   : > { %2396 = vmatprep.subr.bf16.mxu0 %v2550_v3 }
 0x380   : > { %2395 = vmatpush3.bf16.msra.mxu1 %v2394_v24 }
 0x381   : > { %2151 = vmatmul.mubr.msk.f32.vlgmr.msra.gmra.mrb[8].mxu0 %vm291_vm0, %v1016_v52  ;;  %2411 = vmatprep.subr.bf16.mxu1 %v2550_v3  ;;  %v1467_v52 = vld [vmem:[%s3237_s5] sm:$0xff] }
 0x382   : > { %2196 = vmatprep.mubr.msk.f32.mxu0 %vm2552_vm2, %v2551_v11  ;;  %2398 = vmatpush3.bf16.msra.mxu0 %v2397_v60  ;;  %v2426_v54 = vpack.c.bf16 %v1468_v53, %v1467_v52  ;;  %v1473_v60 = vld [vmem:[%s3237_s5 + $0x30] sm:$0xff] }
 0x383   : > { %2399 = vmatprep.subr.bf16.mxu0 %v2550_v3  ;;  %v2438_v62 = vpack.c.bf16 %v1474_v61, %v1473_v60 }
 0x386   : > { %2401 = vmatpush3.bf16.msra.mxu0 %v2400_v0 }
 0x387   : > { %2402 = vmatprep.subr.bf16.mxu0 %v2550_v3 }
 0x38a   : > { %2404 = vmatpush3.bf16.msra.mxu0 %v2403_v7 }
 0x38b   : > { %2405 = vmatprep.subr.bf16.mxu0 %v2550_v3 }
 0x38e   : > { %2407 = vmatpush3.bf16.msra.mxu0 %v2406_v20 }
 0x38f   : > { %2408 = vmatprep.subr.bf16.mxu0 %v2550_v3 }
 0x392   : > { %2410 = vmatpush3.bf16.msra.mxu0 %v2409_v26 }
 0x440   : > { %v939_v8 = vpop.f32.mrb[6].mxu0 }
 0x441   : > { %v1012_v9 = vpop.f32.mrb[6].mxu1  ;;  %v2106_v12 = vpop.f32.mrb[7].mxu0 }
 0x442   : > { %v1013_v10 = vadd.f32 %v1012_v9, %v939_v8  ;;  %v2129_v13 = vpop.f32.mrb[7].mxu1  ;;  %v1384_v12 = vld [vmem:[%s3236_s4 + $0x8] sm:$0xff] }
 0x454   : > { %v1097_v27 = vpop.f32.mrb[8].mxu0 }
 0x455   : > { %v1101_v29 = vadd.f32 %v1097_v27, %v1013_v10  ;;  %v2152_v30 = vpop.f32.mrb[9].mxu0 }
 0x457   : > { %v1110_v31 = vadd.f32 %v1754_v28, %v1101_v29 }
 0x459   : > { %v1111_v32 = vmax.f32 %v1110_v31, 0.0 }
 0x45b   : > { %1113 = vrot.lane.b32.xlu1 %v1111_v32, %s2553_s20 }
 0x4cd   : > { %v1114_v34 = vpop.permute.xlu1 %1113 }
 0x4ce   : > { %1116 = vst.msk [vmem:[#allocation2 + $0x1] sm:$0xff] %vm301_vm3, %v1114_v34 }
 0x4d5   : > { %v1129_v39 = vld [vmem:[#allocation2 + $0x1] sm:$0xff] }
 0x4d6   : > { %v1117_v40 = vld [vmem:[#allocation2] sm:$0xff]  ;;  %2174 = vmatmul.mubr.msk.f32.vlgmr.msra.gmra.mrb[8].mxu1 %vm291_vm0, %v1129_v39 }
 0x4d7   : > { %2197 = vmatmul.mubr.msk.f32.vlgmr.msra.gmra.mrb[10].mxu0 %vm291_vm0, %v1117_v40  ;;  %2413 = vmatpush3.bf16.msra.mxu1 %v2412_v37  ;;  %v1287_v50 = vld [vmem:[#allocation2 + $0x2] sm:$0xff] }
 0x4d8   : > { %2219 = vmatprep.mubr.msk.f32.mxu1 %vm2552_vm2, %v2551_v11  ;;  %2414 = vmatprep.subr.bf16.mxu1 %v2550_v3  ;;  %v1784_v11 = vld [vmem:[%s3234_s2 + $0x3a8] sm:$0xff] }
 0x4d9   : > { %v2421_v46 = vpack.c.bf16 %v1784_v11, %v1783_v45  ;;  %2224 = vmatprep.mubr.msk.f32.mxu0 %vm1385_vm4, %v1383_v51 }
 0x4db   : > { %2416 = vmatpush3.bf16.msra.mxu1 %v2415_v41 }
 0x4dc   : > { %2417 = vmatprep.subr.bf16.mxu1 %v2550_v3 }
 0x4df   : > { %2419 = vmatpush3.bf16.msra.mxu1 %v2418_v44 }
 0x4e0   : > { %2420 = vmatprep.subr.bf16.mxu1 %v2550_v3 }
 0x4e3   : > { %2422 = vmatpush3.bf16.msra.mxu1 %v2421_v46 }
 0x4e4   : > { %2423 = vmatprep.subr.bf16.mxu1 %v2550_v3  ;;  %v1469_v3 = vld [vmem:[%s3237_s5 + $0x10] sm:$0xff] }
 0x4e5   : > { %v2430_v56 = vpack.c.bf16 %v1470_v55, %v1469_v3 }
 0x4e7   : > { %2425 = vmatpush3.bf16.msra.mxu1 %v2424_v49 }
 0x4e8   : > { %2427 = vmatprep.subr.bf16.mxu1 %v2426_v54 }
 0x4ea   : > { %2220 = vmatmul.mubr.msk.f32.vlgmr.msra.gmra.mrb[10].mxu1 %vm291_vm0, %v1287_v50 }
 0x4eb   : > { %2429 = vmatpush3.bf16.msra.mxu1 %v2426_v54 }
 0x4ec   : > { %2431 = vmatprep.subr.bf16.mxu1 %v2430_v56 }
 0x4ef   : > { %2433 = vmatpush3.bf16.msra.mxu1 %v2430_v56 }
 0x4f0   : > { %2435 = vmatprep.subr.bf16.mxu1 %v2434_v59 }
 0x4f3   : > { %2437 = vmatpush3.bf16.msra.mxu1 %v2434_v59 }
 0x4f4   : > { %2439 = vmatprep.subr.bf16.mxu1 %v2438_v62 }
 0x4f7   : > { %2441 = vmatpush3.bf16.msra.mxu1 %v2438_v62 }
 0x5a9   : > { %v1210_v63 = vpop.f32.mrb[8].mxu1 }
 0x5aa   : > { %v1283_v0 = vpop.f32.mrb[10].mxu0  ;;  %v2175_v2 = vpop.f32.mrb[9].mxu1 }
 0x5ab   : > { %v1284_v1 = vadd.f32 %v1283_v0, %v1210_v63  ;;  %v2198_v4 = vpop.f32.mrb[11].mxu0 }
 0x5bd   : > { %v1368_v5 = vpop.f32.mrb[10].mxu1 }
 0x5be   : > { %v1372_v7 = vadd.f32 %v1368_v5, %v1284_v1  ;;  %v2221_v8 = vpop.f32.mrb[11].mxu1 }
 0x5c0   : > { %v1381_v9 = vadd.f32 %v1789_v6, %v1372_v7 }
 0x5c2   : > { %v1382_v10 = vadd.f32 %v1381_v9, %v2980_v33  ;;  %v1792_v33 = vld [vmem:[%s3238_s6] ss:$0 sm:$0xff] }
 0x5c4   : > { %2222 = vmatprep.subr.mxu0 %v1382_v10 }
 0x5c5   : > { %2223 = vmatpush3.msra.mxu0 %v1382_v10 }
 0x5c6   : > { %2225 = vmatmul.mubr.msk.f32.vlgmr.msra.gmra.mrb[12].mxu0 %vm1385_vm4, %v1384_v12 }
 0x699   : > { %v2226_v13 = vpop.f32.mrb[12].mxu0 }
 0x69a   : > { %v1458_v14 = vpop.f32.mrb[13].mxu0 }
 0x69b   : > { %2243 = vmatprep.mubr.msk.f32.mxu1 %vm1482_vm5, %v1458_v14 }
 0x69c   : > { %2244 = vmatmul.mubr.msk.f32.vlgmr.msra.gmra.mrb[12].mxu1 %vm1482_vm5, %v2226_v13 }
 0x76f   : > { %v2245_v15 = vpop.f32.mrb[12].mxu1 }
 0x770   : > { %v1561_v16 = vadd.f32 %v2245_v15, %v1792_v33  ;;  %v1555_v17 = vpop.f32.mrb[13].mxu1 }
 0x771   : > { %v1556_v19 = vadd.f32 %v1792_v33, %v1555_v17 }
 0x772   : > { %1565 = vst [vmem:[%s282_s18 + $0x8] sm:$0xff] %v1561_v16 }
 0x773   : > { %1564 = vst [vmem:[%s282_s18] sm:$0xff] %v1556_v19 }
 0x774   : > { %2499 = shalt.err (!%p2496_p3)
}
 0x775   : > { %s2500_s8 = scalar_lea.hbm %s3188_s29, 256  ;;  %s2504_s18 = scalar_lea.hbm %s3239_s7, 512 }
 0x776   : > { %p2501_p4 = scmp.ne.s32.totalorder %s3188_s29, %s2500_s8  ;;  %p2505_p9 = scmp.lt.u32.totalorder %s3188_s29, %s3239_s7 }
 0x777   : > { %p2506_p10 = scmp.lt.u32.totalorder %s2504_s18, %s2500_s8  ;;  %p2508_p12 = scmp.lt.u32.totalorder %s2500_s8, %s3188_s29 }
 0x778   : > { %p2502_p7 = pnand %p2501_p4, %p2634_p5 }
 0x779   : > { %p2507_p11 = por %p2506_p10, %p2505_p9 }
 0x77a   : > { %p2503_p8 = pneg %p2502_p7 }
 0x77b   : > { %p2509_p13 = por %p2508_p12, %p2507_p11 }
 0x77d   : > { %p2510_p0 = pnand %p2509_p13, %p2503_p8 }
 0x77f   : > { %2513 = shalt.err (!%p2510_p0)
}
 0x780   : > { %s2555_s23 = smov 128  }
 0x781   : > { %2442 = dma.vmem_to_hbm [thread:$0]  (%p2634_p5), %s3183_s19, 256, %s3188_s29, %s3190_s9, %s2555_s23, %s2555_s23, %s2553_s20  }
 0x782 PF: > { %p2448_p1 = scmp.ge.s32.totalorder %s2548_s27, 2  ;;  %s1595_s13 = sand.u32 1, %s2536_s24  }
 0x783   : > { %s1596_s28 = scalar_lea.sflag [#allocation4], %s1595_s13 }
 0x784   : > { %p2445_p2 = pnand %p2448_p1, %p2638_p6 }
 0x786   : > { %2531 = dma.done.wait (!%p2445_p2), %s1596_s28, 256  }
 0x787   : > { %2533 = vsyncadd (!%p2445_p2), %s1596_s28, 4294967040  ;;  %p17_p3 = scmp.ge.s32.totalorder %s2621_s30, 4   ;;  %s3242_s24 = smov %s2540_s25 }
 0x788   : > { %s3243_s25 = smov %s2544_s26  ;;  %s3244_s26 = smov %s2632_s10 }
 0x789   : > { %s3245_s27 = smov %s2621_s30  ;;  %19 = sbr.rel (!%p17_p3) target bundleno = 3 (0x3), region = 100 }
 0x790   :  { %1601 = vsyncpa [#allocation4], 1 }
 0x791   :  { %1603 = vsyncpa [#allocation4 + $0x1], 1 }

</bundles_post_ra>
